<compile_context>
chip_gen: v7x
topology: tpu7x:2x2x1
jax: 0.10.0
libtpu: 0.0.40
codegen_flags: <defaults>
</compile_context>

<pallas_src>
import functools
import math

import jax
import jax.numpy as jnp
from jax import lax
from jax.experimental import pallas as pl
from jax.experimental.pallas import tpu as pltpu


# ---------------------------------------------------------------------------
# helpers
# ---------------------------------------------------------------------------
def _round_up(x, m):
    return ((x + m - 1) // m) * m


def _layer_norm(x, gamma, beta, eps=1e-5):
    # matches nn.LayerNorm over the last dim (biased variance, eps=1e-5), f32 VPU math
    mean = jnp.mean(x, axis=-1, keepdims=True)
    var = jnp.mean((x - mean) ** 2, axis=-1, keepdims=True)
    return (x - mean) * lax.rsqrt(var + eps) * gamma + beta


# ---------------------------------------------------------------------------
# Fused transformer-blocks kernel.  grid = (B, L); one step = one layer of one
# batch element.  The residual stream lives in the (resident) output block
# across the layer axis.
# ---------------------------------------------------------------------------
def blocks_kernel(x_ref, ln1g, ln1b, wqkv, bqkv, ln2g, ln2b, w1, b1, w2, b2,
                  o_ref, *, num_heads, matmul_dtype):
    l = pl.program_id(1)

    @pl.when(l == 0)
    def _():
        o_ref[0] = x_ref[0]            # seed the resident residual stream

    x = o_ref[0]                       # (T, C) f32
    T, C = x.shape
    H = num_heads

    # ----- multi-head causal self-attention on norm1(x) -----
    h = _layer_norm(x, ln1g[0], ln1b[0])                               # (T, C) f32
    hb = jnp.broadcast_to(h.astype(matmul_dtype)[None], (3 * H, T, C))  # (3H, T, C)
    qkv = lax.dot_general(hb, wqkv[0].astype(matmul_dtype),
                          (((2,), (1,)), ((0,), (0,))),
                          preferred_element_type=jnp.float32) + bqkv[0]  # (3H, T, hd)
    # 1/sqrt(hd) is already folded into the Q weights/bias host-side.
    q, k, v = qkv[:H], qkv[H:2 * H], qkv[2 * H:]                        # (H, T, hd)

    # batched QK^T across all heads, no explicit transpose
    s = lax.dot_general(q.astype(matmul_dtype), k.astype(matmul_dtype),
                        (((2,), (2,)), ((0,), (0,))),
                        preferred_element_type=jnp.float32)             # (H, T, T)
    row = lax.broadcasted_iota(jnp.int32, s.shape, 1)
    col = lax.broadcasted_iota(jnp.int32, s.shape, 2)
    s = jnp.where(col <= row, s, -1e30)                                 # finite mask
    s = s - jnp.max(s, axis=-1, keepdims=True)
    p = jnp.exp(s)
    p = p * pl.reciprocal(jnp.sum(p, axis=-1, keepdims=True), approx=True)

    o_heads = lax.dot_general(p.astype(matmul_dtype), v.astype(matmul_dtype),
                              (((2,), (1,)), ((0,), (0,))),
                              preferred_element_type=jnp.float32)        # (H, T, hd)
    # merge heads head-major along lanes (== torch .transpose(1,2).view(B,T,C))
    attn = jnp.concatenate([o_heads[hh] for hh in range(H)], axis=-1)    # (T, C)
    # NOTE: reference MultiHeadAttention defines self.projection but never uses
    # it in forward(), so no output projection is applied.

    # ----- feed-forward on norm2(attn + x) -----
    h2 = _layer_norm(attn + x, ln2g[0], ln2b[0])
    f = jnp.dot(h2.astype(matmul_dtype), w1[0].astype(matmul_dtype),
                preferred_element_type=jnp.float32) + b1[0]
    f = jnp.maximum(f, 0.0)
    f = jnp.dot(f.astype(matmul_dtype), w2[0].astype(matmul_dtype),
                preferred_element_type=jnp.float32) + b2[0]

    # matches the reference exactly: output = feed_forward + x
    o_ref[0] = f + x


# ---------------------------------------------------------------------------
# Final LayerNorm + LM head kernel (vocab-tiled).
# ---------------------------------------------------------------------------
def head_kernel(x_ref, g, b, w, bias, o_ref, *, matmul_dtype):
    h = _layer_norm(x_ref[0], g[...], b[...])                            # (T, C)
    o_ref[0] = (jnp.dot(h.astype(matmul_dtype), w[...].astype(matmul_dtype),
                        preferred_element_type=jnp.float32) + bias[...])


# ---------------------------------------------------------------------------
# pallas_call wrappers
# ---------------------------------------------------------------------------
def run_blocks(x, s, num_heads, matmul_dtype):
    B, T, C = x.shape
    L = s["wqkv"].shape[0]
    H = num_heads
    hd = C // H
    F = s["w1"].shape[-1]

    args = [x, s["ln1g"], s["ln1b"], s["wqkv"], s["bqkv"],
            s["ln2g"], s["ln2b"], s["w1"], s["b1"], s["w2"], s["b2"]]

    def spec3(d1, d2):
        return pl.BlockSpec((1, d1, d2), lambda b, l: (l, 0, 0))

    def spec4(d1, d2, d3):
        return pl.BlockSpec((1, d1, d2, d3), lambda b, l: (l, 0, 0, 0))

    in_specs = [
        pl.BlockSpec((1, T, C), lambda b, l: (b, 0, 0)),   # x (resident over l)
        spec3(1, C), spec3(1, C),                          # ln1 gamma/beta
        spec4(3 * H, C, hd), spec4(3 * H, 1, hd),          # qkv weights / bias
        spec3(1, C), spec3(1, C),                          # ln2 gamma/beta
        spec3(C, F), spec3(1, F),                          # ffn w1 / b1
        spec3(F, C), spec3(1, C),                          # ffn w2 / b2
    ]

    # per-step working set: one layer's weights (double-buffered) + activations
    w_per_layer = sum(int(v.size // v.shape[0]) * v.dtype.itemsize
                      for v in args[1:])
    act = (4 * T * C + 2 * 3 * H * T * hd + 2 * H * T * T + 2 * T * F) * 4
    per_step = 2 * w_per_layer + act
    vmem_limit = int(min(64 * 2 ** 20, max(32 * 2 ** 20, 2 * per_step)))

    return pl.pallas_call(
        functools.partial(blocks_kernel, num_heads=num_heads,
                          matmul_dtype=matmul_dtype),
        out_shape=jax.ShapeDtypeStruct((B, T, C), jnp.float32),
        grid=(B, L),
        in_specs=in_specs,
        out_specs=pl.BlockSpec((1, T, C), lambda b, l: (b, 0, 0)),
        compiler_params=pltpu.CompilerParams(
            dimension_semantics=("parallel", "arbitrary"),
            vmem_limit_bytes=vmem_limit),
    )(*args)


def run_head(x, p, matmul_dtype):
    B, T, C = x.shape
    w = p["w_head"]
    bias = p["b_head"]
    V = w.shape[1]
    TV = min(2048, _round_up(V, 128))          # lane-dense vocab tile
    Vp = _round_up(V, TV)
    if Vp != V:
        w = jnp.pad(w, ((0, 0), (0, Vp - V)))
        bias = jnp.pad(bias, ((0, 0), (0, Vp - V)))
    nj = Vp // TV

    per_step = (2 * C * TV + 2 * T * TV + T * C + TV + 2 * C) * 4
    vmem_limit = int(min(64 * 2 ** 20, max(32 * 2 ** 20, 2 * per_step)))

    out = pl.pallas_call(
        functools.partial(head_kernel, matmul_dtype=matmul_dtype),
        out_shape=jax.ShapeDtypeStruct((B, T, Vp), jnp.float32),
        grid=(B, nj),
        in_specs=[
            pl.BlockSpec((1, T, C), lambda b, j: (b, 0, 0)),
            pl.BlockSpec((1, C), lambda b, j: (0, 0)),
            pl.BlockSpec((1, C), lambda b, j: (0, 0)),
            pl.BlockSpec((C, TV), lambda b, j: (0, j)),
            pl.BlockSpec((1, TV), lambda b, j: (0, j)),
        ],
        out_specs=pl.BlockSpec((1, T, TV), lambda b, j: (b, 0, j)),
        compiler_params=pltpu.CompilerParams(
            dimension_semantics=("parallel", "parallel"),
            vmem_limit_bytes=vmem_limit),
    )(x, p["ln_g"], p["ln_b"], w, bias)
    return out[:, :, :V] if Vp != V else out


def gpt_forward(tokens, params, num_heads, matmul_dtype=jnp.bfloat16):
    # Embedding lookups are pure gathers -> plain JAX glue.
    B, T = tokens.shape
    tok_emb = jnp.take(params["tok_emb"], tokens, axis=0)           # (B, T, C)
    pos_emb = params["pos_emb"][:T]                                 # (T, C)
    x = (tok_emb + pos_emb[None, :, :]).astype(jnp.float32)
    x = run_blocks(x, params["stacked_blocks"], num_heads, matmul_dtype)
    logits = run_head(x, params, matmul_dtype)
    return logits, None  # targets=None path: loss is None
    # TODO(synk): cross-entropy loss branch (targets != None) not implemented in-kernel.


# ---------------------------------------------------------------------------
# Parameter initialization + host-side restructuring for the kernels
# ---------------------------------------------------------------------------
def init_params(key, num_layers, vocab, T, C, F_dim):
    def nrm(k, shape, std=0.02):
        return jax.random.normal(k, shape, jnp.float32) * std

    keys = jax.random.split(key, 3 + 3 * num_layers)
    params = {
        "tok_emb": nrm(keys[0], (vocab, C), 1.0),
        "pos_emb": nrm(keys[1], (T, C), 1.0),
        "ln_g": jnp.ones((1, C), jnp.float32),
        "ln_b": jnp.zeros((1, C), jnp.float32),
        "w_head": nrm(keys[2], (C, vocab)),
        "b_head": jnp.zeros((1, vocab), jnp.float32),
    }
    blocks = []
    for li in range(num_layers):
        k_qkv, k_w1, k_w2 = keys[3 + 3 * li: 3 + 3 * (li + 1)]
        blocks.append({
            "ln1_g": jnp.ones((1, C), jnp.float32),
            "ln1_b": jnp.zeros((1, C), jnp.float32),
            "w_qkv": nrm(k_qkv, (C, 3 * C)),
            "b_qkv": jnp.zeros((1, 3 * C), jnp.float32),
            # (the reference also defines an unused `projection` Linear; omitted)
            "ln2_g": jnp.ones((1, C), jnp.float32),
            "ln2_b": jnp.zeros((1, C), jnp.float32),
            "w1": nrm(k_w1, (C, F_dim)),
            "b1": jnp.zeros((1, F_dim), jnp.float32),
            "w2": nrm(k_w2, (F_dim, C)),
            "b2": jnp.zeros((1, C), jnp.float32),
        })
    params["blocks"] = blocks
    return params


def prepare_block_params(blocks, num_heads):
    """Stack per-layer weights along a leading layer axis and restructure QKV
    weights to (3H, C, hd) so the kernel needs no lane reshapes; the softmax
    scale 1/sqrt(hd) is folded into the Q projection."""
    L = len(blocks)
    C = blocks[0]["w_qkv"].shape[0]
    H = num_heads
    hd = C // H
    scale = 1.0 / math.sqrt(hd)

    def qkv_w(w):                     # (C, 3C) -> (3H, C, hd)
        w4 = w.reshape(C, 3, H, hd).transpose(1, 2, 0, 3)   # (3, H, C, hd)
        w4 = w4.at[0].multiply(scale)                       # fold scale into Q
        return w4.reshape(3 * H, C, hd)

    def qkv_b(b):                     # (1, 3C) -> (3H, 1, hd)
        b3 = b.reshape(3, H, hd)
        b3 = b3.at[0].multiply(scale)
        return b3.reshape(3 * H, 1, hd)

    def stack(fn, name):
        return jnp.stack([fn(blk[name]) for blk in blocks], axis=0)

    ident = lambda a: a
    return {
        "ln1g": stack(ident, "ln1_g"),      # (L, 1, C)
        "ln1b": stack(ident, "ln1_b"),
        "wqkv": stack(qkv_w, "w_qkv"),      # (L, 3H, C, hd)
        "bqkv": stack(qkv_b, "b_qkv"),      # (L, 3H, 1, hd)
        "ln2g": stack(ident, "ln2_g"),
        "ln2b": stack(ident, "ln2_b"),
        "w1": stack(ident, "w1"),           # (L, C, F)
        "b1": stack(ident, "b1"),           # (L, 1, F)
        "w2": stack(ident, "w2"),           # (L, F, C)
        "b2": stack(ident, "b2"),           # (L, 1, C)
    }


# ---------------------------------------------------------------------------
if __name__ == "__main__":
    num_layers = 2
    vocab_size = 64
    num_heads = 4
    seq_length = 8
    hidden_dim = 32
    ff_dim = 64
    batch = 2
    # dropout = 0.0 -> nn.Dropout / SDPA dropout are identity (eval semantics)

    root = jax.random.PRNGKey(0)
    kp, kx = jax.random.split(root)
    params = init_params(kp, num_layers, vocab_size, seq_length, hidden_dim, ff_dim)
    params["stacked_blocks"] = prepare_block_params(params["blocks"], num_heads)
    tokens = jax.random.randint(kx, (batch, seq_length), 0, vocab_size, dtype=jnp.int32)

    logits, loss = gpt_forward(tokens, params, num_heads)
    jax.block_until_ready(logits)
    assert logits.shape == (batch, seq_length, vocab_size)
    assert loss is None
    assert bool(jnp.all(jnp.isfinite(logits)))
    print("KERNEL_OK")
</pallas_src>

<mosaic_0001>
module attributes {stable_mosaic.version = 11 : i64} {
  func.func @blocks_kernel(%arg0: i32, %arg1: i32, %arg2: memref<1x8x32xf32, #tpu.memory_space<vmem>>, %arg3: memref<1x1x32xf32, #tpu.memory_space<vmem>>, %arg4: memref<1x1x32xf32, #tpu.memory_space<vmem>>, %arg5: memref<1x12x32x8xf32, #tpu.memory_space<vmem>>, %arg6: memref<1x12x1x8xf32, #tpu.memory_space<vmem>>, %arg7: memref<1x1x32xf32, #tpu.memory_space<vmem>>, %arg8: memref<1x1x32xf32, #tpu.memory_space<vmem>>, %arg9: memref<1x32x64xf32, #tpu.memory_space<vmem>>, %arg10: memref<1x1x64xf32, #tpu.memory_space<vmem>>, %arg11: memref<1x64x32xf32, #tpu.memory_space<vmem>>, %arg12: memref<1x1x32xf32, #tpu.memory_space<vmem>>, %arg13: memref<1x8x32xf32, #tpu.memory_space<vmem>>) attributes {dimension_semantics = [#tpu.dimension_semantics<parallel>, #tpu.dimension_semantics<arbitrary>], iteration_bounds = array<i64: 2, 2>, scalar_prefetch = 0 : i64, scratch_operands = 0 : i64, tpu.core_type = #tpu.core_type<tc>, window_params = [{transform_indices = @transform_0, window_bounds = array<i64: 1, 8, 32>}, {transform_indices = @transform_1, window_bounds = array<i64: 1, 1, 32>}, {transform_indices = @transform_2, window_bounds = array<i64: 1, 1, 32>}, {transform_indices = @transform_3, window_bounds = array<i64: 1, 12, 32, 8>}, {transform_indices = @transform_4, window_bounds = array<i64: 1, 12, 1, 8>}, {transform_indices = @transform_5, window_bounds = array<i64: 1, 1, 32>}, {transform_indices = @transform_6, window_bounds = array<i64: 1, 1, 32>}, {transform_indices = @transform_7, window_bounds = array<i64: 1, 32, 64>}, {transform_indices = @transform_8, window_bounds = array<i64: 1, 1, 64>}, {transform_indices = @transform_9, window_bounds = array<i64: 1, 64, 32>}, {transform_indices = @transform_10, window_bounds = array<i64: 1, 1, 32>}, {transform_indices = @transform_11, window_bounds = array<i64: 1, 8, 32>}]} {
    %c0_i32 = arith.constant 0 : i32
    %0 = arith.cmpi eq, %arg1, %c0_i32 : i32
    %1 = arith.extui %0 : i1 to i32
    %c0_i32_0 = arith.constant 0 : i32
    %2 = arith.cmpi ne, %1, %c0_i32_0 : i32
    scf.if %2 {
      %c0_56 = arith.constant 0 : index
      %c0_57 = arith.constant 0 : index
      %c0_58 = arith.constant 0 : index
      %127 = vector.load %arg2[%c0_56, %c0_57, %c0_58] : memref<1x8x32xf32, #tpu.memory_space<vmem>>, vector<1x8x32xf32>
      %128 = vector.shape_cast %127 : vector<1x8x32xf32> to vector<8x32xf32>
      %c0_59 = arith.constant 0 : index
      %c0_60 = arith.constant 0 : index
      %c0_61 = arith.constant 0 : index
      %129 = vector.load %arg13[%c0_59, %c0_60, %c0_61] : memref<1x8x32xf32, #tpu.memory_space<vmem>>, vector<1x8x32xf32>
      %130 = vector.shape_cast %129 : vector<1x8x32xf32> to vector<8x32xf32>
      %131 = vector.shape_cast %128 : vector<8x32xf32> to vector<1x8x32xf32>
      tpu.vector_store %arg13[%c0_59, %c0_60, %c0_61], %131 {strides = array<i32>} : memref<1x8x32xf32, #tpu.memory_space<vmem>>, vector<1x8x32xf32>,
    } else {
    }
    %c0 = arith.constant 0 : index
    %c0_1 = arith.constant 0 : index
    %c0_2 = arith.constant 0 : index
    %3 = vector.load %arg13[%c0, %c0_1, %c0_2] : memref<1x8x32xf32, #tpu.memory_space<vmem>>, vector<1x8x32xf32>
    %4 = vector.shape_cast %3 : vector<1x8x32xf32> to vector<8x32xf32>
    %c0_3 = arith.constant 0 : index
    %c0_4 = arith.constant 0 : index
    %c0_5 = arith.constant 0 : index
    %5 = vector.load %arg3[%c0_3, %c0_4, %c0_5] : memref<1x1x32xf32, #tpu.memory_space<vmem>>, vector<1x1x32xf32>
    %6 = vector.shape_cast %5 : vector<1x1x32xf32> to vector<1x32xf32>
    %c0_6 = arith.constant 0 : index
    %c0_7 = arith.constant 0 : index
    %c0_8 = arith.constant 0 : index
    %7 = vector.load %arg4[%c0_6, %c0_7, %c0_8] : memref<1x1x32xf32, #tpu.memory_space<vmem>>, vector<1x1x32xf32>
    %8 = vector.shape_cast %7 : vector<1x1x32xf32> to vector<1x32xf32>
    %cst = arith.constant dense<0.000000e+00> : vector<8xf32>
    %9 = vector.multi_reduction <add>, %4, %cst [1] : vector<8x32xf32> to vector<8xf32>
    %10 = vector.shape_cast %9 : vector<8xf32> to vector<8x1xf32>
    %cst_9 = arith.constant 3.200000e+01 : f32
    %11 = vector.broadcast %cst_9 : f32 to vector<8x1xf32>
    %12 = arith.divf %10, %11 : vector<8x1xf32>
    %13 = vector.broadcast %12 : vector<8x1xf32> to vector<8x32xf32>
    %14 = arith.subf %4, %13 : vector<8x32xf32>
    %15 = arith.mulf %14, %14 : vector<8x32xf32>
    %cst_10 = arith.constant dense<0.000000e+00> : vector<8xf32>
    %16 = vector.multi_reduction <add>, %15, %cst_10 [1] : vector<8x32xf32> to vector<8xf32>
    %17 = vector.shape_cast %16 : vector<8xf32> to vector<8x1xf32>
    %cst_11 = arith.constant 3.200000e+01 : f32
    %18 = vector.broadcast %cst_11 : f32 to vector<8x1xf32>
    %19 = arith.divf %17, %18 : vector<8x1xf32>
    %20 = vector.broadcast %12 : vector<8x1xf32> to vector<8x32xf32>
    %21 = arith.subf %4, %20 : vector<8x32xf32>
    %cst_12 = arith.constant 9.99999974E-6 : f32
    %22 = vector.broadcast %cst_12 : f32 to vector<8x1xf32>
    %23 = arith.addf %19, %22 : vector<8x1xf32>
    %24 = math.rsqrt %23 : vector<8x1xf32>
    %25 = vector.broadcast %24 : vector<8x1xf32> to vector<8x32xf32>
    %26 = arith.mulf %21, %25 : vector<8x32xf32>
    %27 = vector.broadcast %6 : vector<1x32xf32> to vector<8x32xf32>
    %28 = arith.mulf %26, %27 : vector<8x32xf32>
    %29 = vector.broadcast %8 : vector<1x32xf32> to vector<8x32xf32>
    %30 = arith.addf %28, %29 : vector<8x32xf32>
    %31 = arith.truncf %30 : vector<8x32xf32> to vector<8x32xbf16>
    %32 = vector.shape_cast %31 : vector<8x32xbf16> to vector<1x8x32xbf16>
    %33 = vector.shape_cast %32 : vector<1x8x32xbf16> to vector<1x8x32xbf16>
    %34 = vector.broadcast %33 : vector<1x8x32xbf16> to vector<12x8x32xbf16>
    %c0_13 = arith.constant 0 : index
    %c0_14 = arith.constant 0 : index
    %c0_15 = arith.constant 0 : index
    %c0_16 = arith.constant 0 : index
    %35 = vector.load %arg5[%c0_13, %c0_14, %c0_15, %c0_16] : memref<1x12x32x8xf32, #tpu.memory_space<vmem>>, vector<1x12x32x8xf32>
    %36 = vector.shape_cast %35 : vector<1x12x32x8xf32> to vector<12x32x8xf32>
    %37 = arith.truncf %36 : vector<12x32x8xf32> to vector<12x32x8xbf16>
    %cst_17 = arith.constant dense<0.000000e+00> : vector<12x8x8xf32>
    %38 = tpu.matmul %34, %37, %cst_17 {dimension_numbers = #tpu.dot_dimension_numbers<[2], [1], [1], [2], [0, 0, 0, 1, 1, 2], [0], [0]>} : vector<12x8x32xbf16>, vector<12x32x8xbf16>, vector<12x8x8xf32> -> vector<12x8x8xf32>
    %c0_18 = arith.constant 0 : index
    %c0_19 = arith.constant 0 : index
    %c0_20 = arith.constant 0 : index
    %c0_21 = arith.constant 0 : index
    %39 = vector.load %arg6[%c0_18, %c0_19, %c0_20, %c0_21] : memref<1x12x1x8xf32, #tpu.memory_space<vmem>>, vector<1x12x1x8xf32>
    %40 = vector.shape_cast %39 : vector<1x12x1x8xf32> to vector<12x1x8xf32>
    %41 = vector.broadcast %40 : vector<12x1x8xf32> to vector<12x8x8xf32>
    %42 = arith.addf %38, %41 : vector<12x8x8xf32>
    %43 = vector.extract_strided_slice %42 {offsets = [0, 0, 0], sizes = [4, 8, 8], strides = [1, 1, 1]} : vector<12x8x8xf32> to vector<4x8x8xf32>
    %44 = vector.extract_strided_slice %42 {offsets = [4, 0, 0], sizes = [4, 8, 8], strides = [1, 1, 1]} : vector<12x8x8xf32> to vector<4x8x8xf32>
    %45 = vector.extract_strided_slice %42 {offsets = [8, 0, 0], sizes = [4, 8, 8], strides = [1, 1, 1]} : vector<12x8x8xf32> to vector<4x8x8xf32>
    %46 = arith.truncf %43 : vector<4x8x8xf32> to vector<4x8x8xbf16>
    %47 = arith.truncf %44 : vector<4x8x8xf32> to vector<4x8x8xbf16>
    %cst_22 = arith.constant dense<0.000000e+00> : vector<4x8x8xf32>
    %48 = tpu.matmul %46, %47, %cst_22 {dimension_numbers = #tpu.dot_dimension_numbers<[2], [2], [1], [1], [0, 0, 0, 1, 1, 1], [0], [0]>} : vector<4x8x8xbf16>, vector<4x8x8xbf16>, vector<4x8x8xf32> -> vector<4x8x8xf32>
    %49 = tpu.iota {dimensions = array<i32: 1>} : vector<4x8x8xi32>
    %50 = tpu.iota {dimensions = array<i32: 2>} : vector<4x8x8xi32>
    %51 = arith.cmpi sle, %50, %49 : vector<4x8x8xi32>
    %cst_23 = arith.constant -1.000000e+30 : f32
    %52 = vector.broadcast %cst_23 : f32 to vector<4x8x8xf32>
    %53 = arith.select %51, %48, %52 : vector<4x8x8xi1>, vector<4x8x8xf32>
    %cst_24 = arith.constant dense<0xFF800000> : vector<4x8xf32>
    %54 = vector.multi_reduction <maximumf>, %53, %cst_24 [2] : vector<4x8x8xf32> to vector<4x8xf32>
    %55 = vector.shape_cast %54 : vector<4x8xf32> to vector<4x8x1xf32>
    %56 = vector.broadcast %55 : vector<4x8x1xf32> to vector<4x8x8xf32>
    %57 = arith.subf %53, %56 : vector<4x8x8xf32>
    %58 = math.exp %57 : vector<4x8x8xf32>
    %cst_25 = arith.constant dense<0.000000e+00> : vector<4x8xf32>
    %59 = vector.multi_reduction <add>, %58, %cst_25 [2] : vector<4x8x8xf32> to vector<4x8xf32>
    %60 = vector.shape_cast %59 : vector<4x8xf32> to vector<4x8x1xf32>
    %61 = tpu.reciprocal %60 {approx = true} : vector<4x8x1xf32> -> vector<4x8x1xf32>
    %62 = vector.broadcast %61 : vector<4x8x1xf32> to vector<4x8x8xf32>
    %63 = arith.mulf %58, %62 : vector<4x8x8xf32>
    %64 = arith.truncf %63 : vector<4x8x8xf32> to vector<4x8x8xbf16>
    %65 = arith.truncf %45 : vector<4x8x8xf32> to vector<4x8x8xbf16>
    %cst_26 = arith.constant dense<0.000000e+00> : vector<4x8x8xf32>
    %66 = tpu.matmul %64, %65, %cst_26 {dimension_numbers = #tpu.dot_dimension_numbers<[2], [1], [1], [2], [0, 0, 0, 1, 1, 2], [0], [0]>} : vector<4x8x8xbf16>, vector<4x8x8xbf16>, vector<4x8x8xf32> -> vector<4x8x8xf32>
    %67 = vector.extract_strided_slice %66 {offsets = [0, 0, 0], sizes = [1, 8, 8], strides = [1, 1, 1]} : vector<4x8x8xf32> to vector<1x8x8xf32>
    %68 = vector.shape_cast %67 : vector<1x8x8xf32> to vector<8x8xf32>
    %69 = vector.extract_strided_slice %66 {offsets = [1, 0, 0], sizes = [1, 8, 8], strides = [1, 1, 1]} : vector<4x8x8xf32> to vector<1x8x8xf32>
    %70 = vector.shape_cast %69 : vector<1x8x8xf32> to vector<8x8xf32>
    %71 = vector.extract_strided_slice %66 {offsets = [2, 0, 0], sizes = [1, 8, 8], strides = [1, 1, 1]} : vector<4x8x8xf32> to vector<1x8x8xf32>
    %72 = vector.shape_cast %71 : vector<1x8x8xf32> to vector<8x8xf32>
    %73 = vector.extract_strided_slice %66 {offsets = [3, 0, 0], sizes = [1, 8, 8], strides = [1, 1, 1]} : vector<4x8x8xf32> to vector<1x8x8xf32>
    %74 = vector.shape_cast %73 : vector<1x8x8xf32> to vector<8x8xf32>
    %75 = tpu.concatenate %68, %70, %72, %74 in 1 : vector<8x8xf32>, vector<8x8xf32>, vector<8x8xf32>, vector<8x8xf32> -> vector<8x32xf32>
    %76 = arith.addf %75, %4 : vector<8x32xf32>
    %c0_27 = arith.constant 0 : index
    %c0_28 = arith.constant 0 : index
    %c0_29 = arith.constant 0 : index
    %77 = vector.load %arg7[%c0_27, %c0_28, %c0_29] : memref<1x1x32xf32, #tpu.memory_space<vmem>>, vector<1x1x32xf32>
    %78 = vector.shape_cast %77 : vector<1x1x32xf32> to vector<1x32xf32>
    %c0_30 = arith.constant 0 : index
    %c0_31 = arith.constant 0 : index
    %c0_32 = arith.constant 0 : index
    %79 = vector.load %arg8[%c0_30, %c0_31, %c0_32] : memref<1x1x32xf32, #tpu.memory_space<vmem>>, vector<1x1x32xf32>
    %80 = vector.shape_cast %79 : vector<1x1x32xf32> to vector<1x32xf32>
    %cst_33 = arith.constant dense<0.000000e+00> : vector<8xf32>
    %81 = vector.multi_reduction <add>, %76, %cst_33 [1] : vector<8x32xf32> to vector<8xf32>
    %82 = vector.shape_cast %81 : vector<8xf32> to vector<8x1xf32>
    %cst_34 = arith.constant 3.200000e+01 : f32
    %83 = vector.broadcast %cst_34 : f32 to vector<8x1xf32>
    %84 = arith.divf %82, %83 : vector<8x1xf32>
    %85 = vector.broadcast %84 : vector<8x1xf32> to vector<8x32xf32>
    %86 = arith.subf %76, %85 : vector<8x32xf32>
    %87 = arith.mulf %86, %86 : vector<8x32xf32>
    %cst_35 = arith.constant dense<0.000000e+00> : vector<8xf32>
    %88 = vector.multi_reduction <add>, %87, %cst_35 [1] : vector<8x32xf32> to vector<8xf32>
    %89 = vector.shape_cast %88 : vector<8xf32> to vector<8x1xf32>
    %cst_36 = arith.constant 3.200000e+01 : f32
    %90 = vector.broadcast %cst_36 : f32 to vector<8x1xf32>
    %91 = arith.divf %89, %90 : vector<8x1xf32>
    %92 = vector.broadcast %84 : vector<8x1xf32> to vector<8x32xf32>
    %93 = arith.subf %76, %92 : vector<8x32xf32>
    %cst_37 = arith.constant 9.99999974E-6 : f32
    %94 = vector.broadcast %cst_37 : f32 to vector<8x1xf32>
    %95 = arith.addf %91, %94 : vector<8x1xf32>
    %96 = math.rsqrt %95 : vector<8x1xf32>
    %97 = vector.broadcast %96 : vector<8x1xf32> to vector<8x32xf32>
    %98 = arith.mulf %93, %97 : vector<8x32xf32>
    %99 = vector.broadcast %78 : vector<1x32xf32> to vector<8x32xf32>
    %100 = arith.mulf %98, %99 : vector<8x32xf32>
    %101 = vector.broadcast %80 : vector<1x32xf32> to vector<8x32xf32>
    %102 = arith.addf %100, %101 : vector<8x32xf32>
    %103 = arith.truncf %102 : vector<8x32xf32> to vector<8x32xbf16>
    %c0_38 = arith.constant 0 : index
    %c0_39 = arith.constant 0 : index
    %c0_40 = arith.constant 0 : index
    %104 = vector.load %arg9[%c0_38, %c0_39, %c0_40] : memref<1x32x64xf32, #tpu.memory_space<vmem>>, vector<1x32x64xf32>
    %105 = vector.shape_cast %104 : vector<1x32x64xf32> to vector<32x64xf32>
    %106 = arith.truncf %105 : vector<32x64xf32> to vector<32x64xbf16>
    %cst_41 = arith.constant dense<0.000000e+00> : vector<8x64xf32>
    %107 = tpu.matmul %103, %106, %cst_41 {dimension_numbers = #tpu.dot_dimension_numbers<[1], [0], [0], [1], [0, 0, 1, 1], [], []>} : vector<8x32xbf16>, vector<32x64xbf16>, vector<8x64xf32> -> vector<8x64xf32>
    %c0_42 = arith.constant 0 : index
    %c0_43 = arith.constant 0 : index
    %c0_44 = arith.constant 0 : index
    %108 = vector.load %arg10[%c0_42, %c0_43, %c0_44] : memref<1x1x64xf32, #tpu.memory_space<vmem>>, vector<1x1x64xf32>
    %109 = vector.shape_cast %108 : vector<1x1x64xf32> to vector<1x64xf32>
    %110 = vector.broadcast %109 : vector<1x64xf32> to vector<8x64xf32>
    %111 = arith.addf %107, %110 : vector<8x64xf32>
    %cst_45 = arith.constant 0.000000e+00 : f32
    %112 = vector.broadcast %cst_45 : f32 to vector<8x64xf32>
    %113 = arith.maximumf %111, %112 : vector<8x64xf32>
    %114 = arith.truncf %113 : vector<8x64xf32> to vector<8x64xbf16>
    %c0_46 = arith.constant 0 : index
    %c0_47 = arith.constant 0 : index
    %c0_48 = arith.constant 0 : index
    %115 = vector.load %arg11[%c0_46, %c0_47, %c0_48] : memref<1x64x32xf32, #tpu.memory_space<vmem>>, vector<1x64x32xf32>
    %116 = vector.shape_cast %115 : vector<1x64x32xf32> to vector<64x32xf32>
    %117 = arith.truncf %116 : vector<64x32xf32> to vector<64x32xbf16>
    %cst_49 = arith.constant dense<0.000000e+00> : vector<8x32xf32>
    %118 = tpu.matmul %114, %117, %cst_49 {dimension_numbers = #tpu.dot_dimension_numbers<[1], [0], [0], [1], [0, 0, 1, 1], [], []>} : vector<8x64xbf16>, vector<64x32xbf16>, vector<8x32xf32> -> vector<8x32xf32>
    %c0_50 = arith.constant 0 : index
    %c0_51 = arith.constant 0 : index
    %c0_52 = arith.constant 0 : index
    %119 = vector.load %arg12[%c0_50, %c0_51, %c0_52] : memref<1x1x32xf32, #tpu.memory_space<vmem>>, vector<1x1x32xf32>
    %120 = vector.shape_cast %119 : vector<1x1x32xf32> to vector<1x32xf32>
    %121 = vector.broadcast %120 : vector<1x32xf32> to vector<8x32xf32>
    %122 = arith.addf %118, %121 : vector<8x32xf32>
    %123 = arith.addf %122, %4 : vector<8x32xf32>
    %c0_53 = arith.constant 0 : index
    %c0_54 = arith.constant 0 : index
    %c0_55 = arith.constant 0 : index
    %124 = vector.load %arg13[%c0_53, %c0_54, %c0_55] : memref<1x8x32xf32, #tpu.memory_space<vmem>>, vector<1x8x32xf32>
    %125 = vector.shape_cast %124 : vector<1x8x32xf32> to vector<8x32xf32>
    %126 = vector.shape_cast %123 : vector<8x32xf32> to vector<1x8x32xf32>
    tpu.vector_store %arg13[%c0_53, %c0_54, %c0_55], %126 {strides = array<i32>} : memref<1x8x32xf32, #tpu.memory_space<vmem>>, vector<1x8x32xf32>,
    return
  }
  func.func @transform_0(%arg0: i32, %arg1: i32) -> (i32, i32, i32) {
    %c0_i32 = arith.constant 0 : i32
    %c0_i32_0 = arith.constant 0 : i32
    %c0_i32_1 = arith.constant 0 : i32
    return %arg0, %c0_i32, %c0_i32_0 : i32, i32, i32
  }
  func.func @transform_1(%arg0: i32, %arg1: i32) -> (i32, i32, i32) {
    %c0_i32 = arith.constant 0 : i32
    %c0_i32_0 = arith.constant 0 : i32
    %c0_i32_1 = arith.constant 0 : i32
    return %arg1, %c0_i32, %c0_i32_0 : i32, i32, i32
  }
  func.func @transform_2(%arg0: i32, %arg1: i32) -> (i32, i32, i32) {
    %c0_i32 = arith.constant 0 : i32
    %c0_i32_0 = arith.constant 0 : i32
    %c0_i32_1 = arith.constant 0 : i32
    return %arg1, %c0_i32, %c0_i32_0 : i32, i32, i32
  }
  func.func @transform_3(%arg0: i32, %arg1: i32) -> (i32, i32, i32, i32) {
    %c0_i32 = arith.constant 0 : i32
    %c0_i32_0 = arith.constant 0 : i32
    %c0_i32_1 = arith.constant 0 : i32
    %c0_i32_2 = arith.constant 0 : i32
    return %arg1, %c0_i32, %c0_i32_0, %c0_i32_1 : i32, i32, i32, i32
  }
  func.func @transform_4(%arg0: i32, %arg1: i32) -> (i32, i32, i32, i32) {
    %c0_i32 = arith.constant 0 : i32
    %c0_i32_0 = arith.constant 0 : i32
    %c0_i32_1 = arith.constant 0 : i32
    %c0_i32_2 = arith.constant 0 : i32
    return %arg1, %c0_i32, %c0_i32_0, %c0_i32_1 : i32, i32, i32, i32
  }
  func.func @transform_5(%arg0: i32, %arg1: i32) -> (i32, i32, i32) {
    %c0_i32 = arith.constant 0 : i32
    %c0_i32_0 = arith.constant 0 : i32
    %c0_i32_1 = arith.constant 0 : i32
    return %arg1, %c0_i32, %c0_i32_0 : i32, i32, i32
  }
  func.func @transform_6(%arg0: i32, %arg1: i32) -> (i32, i32, i32) {
    %c0_i32 = arith.constant 0 : i32
    %c0_i32_0 = arith.constant 0 : i32
    %c0_i32_1 = arith.constant 0 : i32
    return %arg1, %c0_i32, %c0_i32_0 : i32, i32, i32
  }
  func.func @transform_7(%arg0: i32, %arg1: i32) -> (i32, i32, i32) {
    %c0_i32 = arith.constant 0 : i32
    %c0_i32_0 = arith.constant 0 : i32
    %c0_i32_1 = arith.constant 0 : i32
    return %arg1, %c0_i32, %c0_i32_0 : i32, i32, i32
  }
  func.func @transform_8(%arg0: i32, %arg1: i32) -> (i32, i32, i32) {
    %c0_i32 = arith.constant 0 : i32
    %c0_i32_0 = arith.constant 0 : i32
    %c0_i32_1 = arith.constant 0 : i32
    return %arg1, %c0_i32, %c0_i32_0 : i32, i32, i32
  }
  func.func @transform_9(%arg0: i32, %arg1: i32) -> (i32, i32, i32) {
    %c0_i32 = arith.constant 0 : i32
    %c0_i32_0 = arith.constant 0 : i32
    %c0_i32_1 = arith.constant 0 : i32
    return %arg1, %c0_i32, %c0_i32_0 : i32, i32, i32
  }
  func.func @transform_10(%arg0: i32, %arg1: i32) -> (i32, i32, i32) {
    %c0_i32 = arith.constant 0 : i32
    %c0_i32_0 = arith.constant 0 : i32
    %c0_i32_1 = arith.constant 0 : i32
    return %arg1, %c0_i32, %c0_i32_0 : i32, i32, i32
  }
  func.func @transform_11(%arg0: i32, %arg1: i32) -> (i32, i32, i32) {
    %c0_i32 = arith.constant 0 : i32
    %c0_i32_0 = arith.constant 0 : i32
    %c0_i32_1 = arith.constant 0 : i32
    return %arg0, %c0_i32, %c0_i32_0 : i32, i32, i32
  }
}

</mosaic_0001>

<bundles_post_ra>
// kernel: tpu_custom_call.1
= control target key start
LH: loop header
LB: loop body
LE: loop exit
PB: predicated region body
PF: predicated region fallthrough
CT: control target
= control target key end

     0   :  { %s3026_s0 = inlined_call_operand.vmem [shape: f32[2,8,32], index: 0, kind: input, shape index: {}]   ;;  %s3027_s1 = inlined_call_operand.vmem [shape: f32[2,1,32], index: 1, kind: input, shape index: {}]   ;;  %s3028_s2 = inlined_call_operand.vmem [shape: f32[2,1,32], index: 2, kind: input, shape index: {}]   ;;  %s3029_s3 = inlined_call_operand.vmem [shape: f32[2,12,32,8], index: 3, kind: input, shape index: {}]   ;;  %s3030_s4 = inlined_call_operand.vmem [shape: f32[2,12,1,8], index: 4, kind: input, shape index: {}]   ;;  %s3031_s5 = inlined_call_operand.vmem [shape: f32[2,1,32], index: 5, kind: input, shape index: {}]   ;;  %s3032_s6 = inlined_call_operand.vmem [shape: f32[2,1,32], index: 6, kind: input, shape index: {}]   ;;  %s3033_s7 = inlined_call_operand.vmem [shape: f32[2,32,64], index: 7, kind: input, shape index: {}]   ;;  %s3034_s8 = inlined_call_operand.vmem [shape: f32[2,1,64], index: 8, kind: input, shape index: {}]   ;;  %s3035_s9 = inlined_call_operand.vmem [shape: f32[2,64,32], index: 9, kind: input, shape index: {}]   ;;  %s3036_s10 = inlined_call_operand.vmem [shape: f32[2,1,32], index: 10, kind: input, shape index: {}]   ;;  %s3037_s11 = inlined_call_operand.hbm [shape: f32[2,8,32], index: 11, kind: output, shape index: {}]  }
   0x1   :  { %3053 = sst [smem:[#allocation18_spill]] %s3026_s0 }
   0x2   :  { %3054 = sst [smem:[#allocation19_spill]] %s3037_s11 }
   0x3   :  { %16 = vsyncpa [#allocation3], 0 }
   0x4   :  { %18 = vsyncpa [#allocation3 + $0x1], 0  ;;  %s2574_s17 = smov 0   ;;  %s2576_s18 = smov 0  }
   0x5   :  { %s2578_s19 = smov 0   ;;  %s2580_s20 = smov 0  }
   0x6   :  { %s2582_s21 = smov 0   ;;  %s2584_s22 = smov 0  }
   0x7   :  { %s2586_s23 = smov 0   ;;  %s2588_s24 = smov 0  }
   0x8 LB: > { %3055 = sst [smem:[#allocation5_spill]] %s2478_s17  ;;  %s2031_s25 = sadd.s32 4294967295, %s2506_s24   ;;  %s2506_s24 = sphi %s2588_s24, %s24_s24   ;;  %s2502_s23 = sphi %s2586_s23, %s3091_s23   ;;  %s2498_s22 = sphi %s2584_s22, %s3090_s22   ;;  %s2494_s21 = sphi %s2582_s21, %s3089_s21   ;;  %s2490_s20 = sphi %s2580_s20, %s3088_s20   ;;  %s2486_s19 = sphi %s2578_s19, %s3087_s19   ;;  %s2482_s18 = sphi %s2576_s18, %s3086_s18   ;;  %s2478_s17 = sphi %s2574_s17, %s3085_s17  }
   0x9   : > { %3056 = sst [smem:[#allocation6_spill]] %s2482_s18  ;;  %s2032_s26 = sadd.s32 4294967294, %s2506_s24  }
   0xa   : > { %3057 = sst [smem:[#allocation7_spill]] %s2486_s19  ;;  %s33_s27 = sadd.s32 1, %s2498_s22 }
   0xb   : > { %3058 = sst [smem:[#allocation8_spill]] %s2490_s20  ;;  %p34_p0 = scmp.ge.s32.totalorder %s33_s27, 2 }
   0xc   : > { %3059 = sst [smem:[#allocation9_spill]] %s2494_s21  ;;  %s36_s28 = sadd.s32 1, %s2502_s23 }
   0xd   : > { %3060 = sst [smem:[#allocation10_spill]] %s2498_s22  ;;  %p339_p1 = scmp.ne.s32.totalorder %s2486_s19, %s2482_s18 }
   0xe   : > { %3061 = sst [smem:[#allocation11_spill]] %s2502_s23  ;;  %p340_p2 = scmp.eq.s32.totalorder %s2031_s25, 3 }
   0xf   : > { %3062 = sst [smem:[#allocation12_spill]] %s2506_s24  ;;  %s3093_s27 = smov (%p34_p0, %s33_s27), 0 }
  0x10   : > { %3063 = sst [smem:[#allocation13_spill]] %s3093_s27  ;;  %s3095_s28 = smov (!%p34_p0, %s36_s28), %s2502_s23 }
  0x11   : > { %p2623_p3 = por %p340_p2, %p339_p1  ;;  %p345_p4 = scmp.ne.s32.totalorder %s2482_s18, %s2478_s17 }
  0x12   : > { %p38_p5 = scmp.ge.s32.totalorder %s3095_s28, 2  ;;  %p346_p6 = scmp.eq.s32.totalorder %s2032_s26, 3 }
  0x13   : > { %s3064_s29 = scalar_select %p2623_p3, 1, 0 }
  0x14   : > { %p2035_p7 = scmp.ge.s32.totalorder %s2506_s24, 1  ;;  %p438_p8 = scmp.lt.s32.totalorder %s2506_s24, 5 }
  0x15   : > { %3065 = sst [smem:[#allocation14_spill]] %s3064_s29  ;;  %s3097_s28 = smov (%p38_p5, %s3095_s28), 0 }
  0x16   : > { %3066 = sst [smem:[#allocation15_spill]] %s3097_s28  ;;  %p2633_p9 = por %p346_p6, %p345_p4 }
  0x17   : > { %p439_p10 = pnand %p2035_p7, %p438_p8  ;;  %s326_s12 = ssub.s32 %s2502_s23, %s3097_s28 }
  0x18   : > { %s3067_s30 = scalar_select %p2633_p9, 1, 0 }
  0x19   : > { %s329_s13 = sadd.s32 1, %s2486_s19  ;;  %p327_p11 = scmp.eq.s32.totalorder %s326_s12, 0 }
  0x1a   : > { %3068 = sst [smem:[#allocation16_spill]] %s3067_s30  ;;  %442 = sbr.rel (%p439_p10) target bundleno = 2241 (0x8c1), region = 64 }
  0x1b   : > { %s2641_s14 = scalar_select %p327_p11, %s2486_s19, %s329_s13  }
  0x1c   : > { %s3039_s15 = sand.u32 (!%p439_p10), 1, %s2482_s18   ;;  %p514_p12 = scmp.lt.s32.totalorder (!%p439_p10), %s2494_s21, 1 }
  0x1d   : > { %3069 = sst [smem:[#allocation17_spill]] %s2641_s14  ;;  %s2036_s16 = sshll.u32 (!%p439_p10), %s3039_s15, 3 }
  0x1e   : > { %p518_p13 = scmp.lt.s32.totalorder (!%p439_p10), %s2490_s20, 1  ;;  %s3070_s0 = sld [smem:[#allocation18_spill]] (!%p439_p10) }
  0x1f   : > { %s2703_s15 = scalar_lea.vmem (!%p439_p10), [#allocation2], %s2036_s16  ;;  %s3071_s13 = sld [smem:[#allocation8_spill]] (!%p439_p10) }
  0x21   : > { %s515_s25 = scalar_select %p514_p12, %s2494_s21, 1 }
  0x22   : > { %s2650_s26 = scalar_select %p518_p13, %s2490_s20, 1 }
  0x23   : > { %s2037_s12 = sshll.u32 %s515_s25, 3 }
  0x24   : > { %s517_s27 = scalar_lea.vmem %s3070_s0, %s2037_s12  ;;  %s2314_s17 = smul.u32 384, %s2650_s26 }
  0x25   : > { %s2315_s24 = smul.u32 12, %s2650_s26  ;;  %s2088_s14 = sshll.u32 %s2650_s26, 5 }
  0x26   : > { %s2672_s20 = scalar_lea.vmem %s3029_s3, %s2314_s17  ;;  %s2687_s11 = scalar_lea.vmem %s3033_s7, %s2088_s14 }
  0x27   : > { %s2681_s19 = scalar_lea.vmem %s3030_s4, %s2315_s24  ;;  %s546_s17 = scalar_lea.vmem %s3034_s8, %s2650_s26 }
  0x28   : > { %s2089_s21 = sshll.u32 %s2650_s26, 6  ;;  %s554_s28 = scalar_lea.vmem %s3036_s10, %s2650_s26 }
  0x29   : > { %s2701_s24 = scalar_lea.vmem %s3035_s9, %s2089_s21  ;;  %p2043_p0 = scmp.ne.s32.totalorder %s3071_s13, 0 }
  0x2a   : > { %v560_v0 = vld [vmem:[%s517_s27] sm:$0xff] (!%p2043_p0)  ;;  %vm561_vm0 = vcmask (!%p2043_p0), 261120  }
  0x2b   : > { %559 = sbr.rel (%p2043_p0) target bundleno = 50 (0x32), region = 68  ;;  %562 = vst.msk [vmem:[%s2703_s15] sm:$0xff] (!%p2043_p0), %vm561_vm0, %v560_v0 }
  0x32 PF: > { %v2708_v1 = vld [vmem:[%s2703_s15] sm:$0xff]  ;;  %vm566_vm1 = vcmask 261120   ;;  %v2508_v13 = vmov 0.0   ;;  %v598_v15 = vld [vmem:[%s2672_s20 + $0x10] sm:$0xff]  ;;  %v599_v16 = vld [vmem:[%s2672_s20 + $0x18] sm:$0xff]  ;;  %vm2509_vm2 = vmmov 0   ;;  %s3072_s22 = scalar_lea.vmem %s3027_s1, %s2650_s26  ;;  %s3073_s16 = scalar_lea.vmem %s3028_s2, %s2650_s26 }
  0x33   : > { %v567_v2 = vsel %vm566_vm1, %v2708_v1, 0.0  ;;  %v596_v8 = vld [vmem:[%s2672_s20] sm:$0xff]  ;;  %v597_v9 = vld [vmem:[%s2672_s20 + $0x8] sm:$0xff]  ;;  %2150 = vmatprep.subr.bf16.mxu0 %v2508_v13  ;;  %2158 = vmatprep.subr.bf16.mxu1 %v2508_v13  ;;  %v602_v17 = vld [vmem:[%s2672_s20 + $0x30] sm:$0xff]  ;;  %v645_v18 = vpack.c.bf16 %v599_v16, %v598_v15  ;;  %vm1243_vm3 = vcmask 64512   ;;  %vm1492_vm4 = vcmask 1043456   ;;  %s3074_s29 = scalar_lea.vmem %s3031_s5, %s2650_s26  ;;  %s3075_s12 = scalar_lea.vmem %s3032_s6, %s2650_s26 }
  0x34   : > { %568 = vadd.xlane.f32.xlu0 %v567_v2  ;;  %v600_v10 = vld [vmem:[%s2672_s20 + $0x20] sm:$0xff]  ;;  %v644_v11 = vpack.c.bf16 %v597_v9, %v596_v8  ;;  %v601_v12 = vld [vmem:[%s2672_s20 + $0x28] sm:$0xff]  ;;  %v603_v19 = vld [vmem:[%s2672_s20 + $0x38] sm:$0xff]  ;;  %2154 = vmatprep.mubr.msk.bf16.mxu0 %vm2509_vm2, %v2508_v13  ;;  %s2511_s23 = smov 16   ;;  %vm1687_vm6 = vcmask 130048   ;;  %vm1689_vm7 = vcmask 195584  }
  0x35   : > { %v646_v14 = vpack.c.bf16 %v601_v12, %v600_v10  ;;  %v647_v20 = vpack.c.bf16 %v603_v19, %v602_v17  ;;  %2162 = vmatprep.mubr.msk.bf16.mxu1 %vm2509_vm2, %v2508_v13  ;;  %v2044_v25 = vld [vmem:[%s3072_s22] ss:$0 sm:$0xff]  ;;  %v605_v30 = vld [vmem:[%s2672_s20 + $0x48] sm:$0xff]  ;;  %v606_v36 = vld [vmem:[%s2672_s20 + $0x50] sm:$0xff]  ;;  %s3076_s13 = sld [smem:[#allocation9_spill]]  ;;  %s3077_s22 = sld [smem:[#allocation6_spill]] }
  0x36   : > { %2151 = vmatpush3.bf16.msra.mxu0 %v644_v11  ;;  %v2045_v27 = vld [vmem:[%s3073_s16] ss:$0 sm:$0xff]  ;;  %v609_v32 = vld [vmem:[%s2672_s20 + $0x68] sm:$0xff]  ;;  %v607_v38 = vld [vmem:[%s2672_s20 + $0x58] sm:$0xff]  ;;  %vm1799_vm8 = vcmask 523264   ;;  %s2513_s21 = smov [#allocation2]  }
  0x37   : > { %2159 = vmatpush3.bf16.msra.mxu1 %v646_v14  ;;  %2152 = vmatprep.subr.bf16.mxu0 %v2508_v13  ;;  %v604_v28 = vld [vmem:[%s2672_s20 + $0x40] sm:$0xff]  ;;  %v610_v39 = vld [vmem:[%s2672_s20 + $0x70] sm:$0xff]  ;;  %v611_v40 = vld [vmem:[%s2672_s20 + $0x78] sm:$0xff]  ;;  %v649_v41 = vpack.c.bf16 %v607_v38, %v606_v36  ;;  %s2416_s25 = sshll.u32 %s2513_s21, 4  ;;  %s2417_s25 = int_to_ptr.vmem [resolvable:$false] %s2416_s25 }
  0x38   : > { %2160 = vmatprep.subr.bf16.mxu1 %v2508_v13  ;;  %v608_v31 = vld [vmem:[%s2672_s20 + $0x60] sm:$0xff]  ;;  %v648_v34 = vpack.c.bf16 %v605_v30, %v604_v28  ;;  %v651_v42 = vpack.c.bf16 %v611_v40, %v610_v39  ;;  %v613_v44 = vld [vmem:[%s2672_s20 + $0x88] sm:$0xff]  ;;  %v614_v49 = vld [vmem:[%s2672_s20 + $0x90] sm:$0xff] }
  0x39   : > { %v650_v35 = vpack.c.bf16 %v609_v32, %v608_v31  ;;  %v612_v43 = vld [vmem:[%s2672_s20 + $0x80] sm:$0xff]  ;;  %v617_v46 = vld [vmem:[%s2672_s20 + $0xa8] sm:$0xff]  ;;  %v615_v50 = vld [vmem:[%s2672_s20 + $0x98] sm:$0xff] }
  0x3a   : > { %2153 = vmatpush3.bf16.msra.mxu0 %v645_v18  ;;  %v616_v45 = vld [vmem:[%s2672_s20 + $0xa0] sm:$0xff]  ;;  %v652_v47 = vpack.c.bf16 %v613_v44, %v612_v43  ;;  %v618_v51 = vld [vmem:[%s2672_s20 + $0xb0] sm:$0xff]  ;;  %v619_v52 = vld [vmem:[%s2672_s20 + $0xb8] sm:$0xff]  ;;  %v653_v53 = vpack.c.bf16 %v615_v50, %v614_v49 }
  0x3b   : > { %2161 = vmatpush3.bf16.msra.mxu1 %v647_v20  ;;  %2166 = vmatprep.subr.bf16.mxu0 %v2508_v13  ;;  %v654_v48 = vpack.c.bf16 %v617_v46, %v616_v45  ;;  %v655_v54 = vpack.c.bf16 %v619_v52, %v618_v51  ;;  %v620_v55 = vld [vmem:[%s2672_s20 + $0xc0] sm:$0xff]  ;;  %v621_v56 = vld [vmem:[%s2672_s20 + $0xc8] sm:$0xff]  ;;  %v622_v61 = vld [vmem:[%s2672_s20 + $0xd0] sm:$0xff]  ;;  %s2085_s16 = sshll.u32 %s3076_s13, 7  ;;  %s3081_s26 = sand.u32 1, %s3077_s22  }
  0x3c   : > { %2174 = vmatprep.subr.bf16.mxu1 %v2508_v13  ;;  %v624_v57 = vld [vmem:[%s2672_s20 + $0xe0] sm:$0xff]  ;;  %v625_v58 = vld [vmem:[%s2672_s20 + $0xe8] sm:$0xff]  ;;  %v656_v59 = vpack.c.bf16 %v621_v56, %v620_v55  ;;  %v623_v62 = vld [vmem:[%s2672_s20 + $0xd8] sm:$0xff] }
  0x3d   : > { %v658_v60 = vpack.c.bf16 %v625_v58, %v624_v57  ;;  %v626_v63 = vld [vmem:[%s2672_s20 + $0xf0] sm:$0xff]  ;;  %v627_v0 = vld [vmem:[%s2672_s20 + $0xf8] sm:$0xff]  ;;  %v657_v2 = vpack.c.bf16 %v623_v62, %v622_v61  ;;  %v636_v17 = vld [vmem:[%s2672_s20 + $0x140] sm:$0xff] }
  0x3e   : > { %v630_v10 = vld [vmem:[%s2672_s20 + $0x110] sm:$0xff]  ;;  %v631_v11 = vld [vmem:[%s2672_s20 + $0x118] sm:$0xff]  ;;  %v637_v18 = vld [vmem:[%s2672_s20 + $0x148] sm:$0xff] }
  0x3f   : > { %v634_v12 = vld [vmem:[%s2672_s20 + $0x130] sm:$0xff]  ;;  %v635_v14 = vld [vmem:[%s2672_s20 + $0x138] sm:$0xff]  ;;  %v661_v15 = vpack.c.bf16 %v631_v11, %v630_v10  ;;  %v640_v19 = vld [vmem:[%s2672_s20 + $0x160] sm:$0xff] }
  0x40   : > { %v663_v16 = vpack.c.bf16 %v635_v14, %v634_v12  ;;  %v641_v20 = vld [vmem:[%s2672_s20 + $0x168] sm:$0xff]  ;;  %v2050_v45 = vld [vmem:[%s2681_s19 + $0x4] ss:$0 sm:$0xff]  ;;  %v2051_v46 = vld [vmem:[%s2681_s19 + $0x5] ss:$0 sm:$0xff] }
  0xc1   : > { %v569_v3 = vpop.xlane.xlu0 %568 }
  0xc2   : > { %v571_v4 = vmul.f32 0.03125, %v569_v3  ;;  %v659_v3 = vpack.c.bf16 %v627_v0, %v626_v63  ;;  %v2052_v63 = vld [vmem:[%s2681_s19 + $0x6] ss:$0 sm:$0xff]  ;;  %v2053_v0 = vld [vmem:[%s2681_s19 + $0x7] ss:$0 sm:$0xff] }
  0xc4   : > { %v572_v5 = vsub.f32 %v2708_v1, %v571_v4  ;;  %v628_v4 = vld [vmem:[%s2672_s20 + $0x100] sm:$0xff] }
  0xc6   : > { %v573_v6 = vmul.f32 %v572_v5, %v572_v5 }
  0xc8   : > { %v574_v7 = vsel %vm566_vm1, %v573_v6, 0.0  ;;  %v632_v6 = vld [vmem:[%s2672_s20 + $0x120] sm:$0xff] }
  0xc9   : > { %575 = vadd.xlane.f32.xlu0 %v574_v7  ;;  %v633_v7 = vld [vmem:[%s2672_s20 + $0x128] sm:$0xff] }
  0xca   : > { %v662_v9 = vpack.c.bf16 %v633_v7, %v632_v6 }
 0x156   : > { %v576_v21 = vpop.xlane.xlu0 %575 }
 0x157   : > { %v577_v22 = vmul.f32 0.03125, %v576_v21  ;;  %v664_v21 = vpack.c.bf16 %v637_v18, %v636_v17 }
 0x159   : > { %v578_v23 = vadd.f32 1e-05, %v577_v22  ;;  %v666_v22 = vpack.c.bf16 %v641_v20, %v640_v19  ;;  %v2048_v19 = vld [vmem:[%s2681_s19 + $0x2] ss:$0 sm:$0xff]  ;;  %v2049_v20 = vld [vmem:[%s2681_s19 + $0x3] ss:$0 sm:$0xff] }
 0x15b   : > { %2392 = vrsqrt.f32 %v578_v23  ;;  %v638_v23 = vld [vmem:[%s2672_s20 + $0x150] sm:$0xff] }
 0x165   : > { %v2393_v24 = vpop.eup %2392 }
 0x166   : > { %v580_v26 = vmul.f32 %v2393_v24, %v572_v5  ;;  %v629_v5 = vld [vmem:[%s2672_s20 + $0x108] sm:$0xff]  ;;  %v639_v24 = vld [vmem:[%s2672_s20 + $0x158] sm:$0xff] }
 0x167   : > { %v660_v8 = vpack.c.bf16 %v629_v5, %v628_v4 }
 0x168   : > { %v587_v29 = vmul.f32 %v2044_v25, %v580_v26  ;;  %v642_v25 = vld [vmem:[%s2672_s20 + $0x170] sm:$0xff]  ;;  %v643_v26 = vld [vmem:[%s2672_s20 + $0x178] sm:$0xff]  ;;  %s2510_s20 = smov 8  }
 0x169   : > { %v667_v28 = vpack.c.bf16 %v643_v26, %v642_v25 }
 0x16a   : > { %v594_v33 = vadd.f32 %v2045_v27, %v587_v29  ;;  %v665_v27 = vpack.c.bf16 %v639_v24, %v638_v23  ;;  %v2054_v23 = vld [vmem:[%s2681_s19 + $0x8] ss:$0 sm:$0xff]  ;;  %v2055_v24 = vld [vmem:[%s2681_s19 + $0x9] ss:$0 sm:$0xff] }
 0x16c   : > { %v2747_v37 = vpack.c.bf16 %v594_v33, %v594_v33 }
 0x16e   : > { %2155 = vmatmul.mubr.msk.bf16.vlgmr.msra.gmra.mrb[0].mxu0 %vm566_vm1, %v2747_v37  ;;  %2163 = vmatmul.mubr.msk.bf16.vlgmr.msra.gmra.mrb[0].mxu1 %vm566_vm1, %v2747_v37 }
 0x16f   : > { %2167 = vmatpush3.bf16.msra.mxu0 %v648_v34  ;;  %2175 = vmatpush3.bf16.msra.mxu1 %v650_v35 }
 0x170   : > { %2168 = vmatprep.subr.bf16.mxu0 %v2508_v13  ;;  %2176 = vmatprep.subr.bf16.mxu1 %v2508_v13 }
 0x171   : > { %2170 = vmatprep.mubr.msk.bf16.mxu0 %vm2509_vm2, %v2508_v13  ;;  %2178 = vmatprep.mubr.msk.bf16.mxu1 %vm2509_vm2, %v2508_v13 }
 0x173   : > { %2169 = vmatpush3.bf16.msra.mxu0 %v649_v41  ;;  %2177 = vmatpush3.bf16.msra.mxu1 %v651_v42 }
 0x174   : > { %2182 = vmatprep.subr.bf16.mxu0 %v2508_v13  ;;  %2190 = vmatprep.subr.bf16.mxu1 %v2508_v13 }
 0x176   : > { %2171 = vmatmul.mubr.msk.bf16.vlgmr.msra.gmra.mrb[4].mxu0 %vm566_vm1, %v2747_v37  ;;  %2179 = vmatmul.mubr.msk.bf16.vlgmr.msra.gmra.mrb[4].mxu1 %vm566_vm1, %v2747_v37 }
 0x177   : > { %2183 = vmatpush3.bf16.msra.mxu0 %v652_v47  ;;  %2191 = vmatpush3.bf16.msra.mxu1 %v654_v48 }
 0x178   : > { %2184 = vmatprep.subr.bf16.mxu0 %v2508_v13  ;;  %2192 = vmatprep.subr.bf16.mxu1 %v2508_v13 }
 0x179   : > { %2186 = vmatprep.mubr.msk.bf16.mxu0 %vm2509_vm2, %v2508_v13  ;;  %2194 = vmatprep.mubr.msk.bf16.mxu1 %vm2509_vm2, %v2508_v13 }
 0x17b   : > { %2185 = vmatpush3.bf16.msra.mxu0 %v653_v53  ;;  %2193 = vmatpush3.bf16.msra.mxu1 %v655_v54 }
 0x17c   : > { %2198 = vmatprep.subr.bf16.mxu0 %v2508_v13  ;;  %2206 = vmatprep.subr.bf16.mxu1 %v2508_v13 }
 0x17e   : > { %2187 = vmatmul.mubr.msk.bf16.vlgmr.msra.gmra.mrb[8].mxu0 %vm566_vm1, %v2747_v37  ;;  %2195 = vmatmul.mubr.msk.bf16.vlgmr.msra.gmra.mrb[8].mxu1 %vm566_vm1, %v2747_v37 }
 0x17f   : > { %2199 = vmatpush3.bf16.msra.mxu0 %v656_v59  ;;  %2207 = vmatpush3.bf16.msra.mxu1 %v658_v60  ;;  %v2046_v59 = vld [vmem:[%s2681_s19] ss:$0 sm:$0xff]  ;;  %v2047_v60 = vld [vmem:[%s2681_s19 + $0x1] ss:$0 sm:$0xff] }
 0x180   : > { %2200 = vmatprep.subr.bf16.mxu0 %v2508_v13  ;;  %2208 = vmatprep.subr.bf16.mxu1 %v2508_v13 }
 0x181   : > { %2202 = vmatprep.mubr.msk.bf16.mxu0 %vm2509_vm2, %v2508_v13  ;;  %2210 = vmatprep.mubr.msk.bf16.mxu1 %vm2509_vm2, %v2508_v13 }
 0x183   : > { %2201 = vmatpush3.bf16.msra.mxu0 %v657_v2  ;;  %2209 = vmatpush3.bf16.msra.mxu1 %v659_v3 }
 0x184   : > { %2214 = vmatprep.subr.bf16.mxu0 %v2508_v13  ;;  %2222 = vmatprep.subr.bf16.mxu1 %v2508_v13 }
 0x186   : > { %2203 = vmatmul.mubr.msk.bf16.vlgmr.msra.gmra.mrb[12].mxu0 %vm566_vm1, %v2747_v37  ;;  %2211 = vmatmul.mubr.msk.bf16.vlgmr.msra.gmra.mrb[12].mxu1 %vm566_vm1, %v2747_v37 }
 0x187   : > { %2215 = vmatpush3.bf16.msra.mxu0 %v660_v8  ;;  %2223 = vmatpush3.bf16.msra.mxu1 %v662_v9 }
 0x188   : > { %2216 = vmatprep.subr.bf16.mxu0 %v2508_v13  ;;  %2224 = vmatprep.subr.bf16.mxu1 %v2508_v13 }
 0x189   : > { %2218 = vmatprep.mubr.msk.bf16.mxu0 %vm2509_vm2, %v2508_v13  ;;  %2226 = vmatprep.mubr.msk.bf16.mxu1 %vm2509_vm2, %v2508_v13 }
 0x18b   : > { %2217 = vmatpush3.bf16.msra.mxu0 %v661_v15  ;;  %2225 = vmatpush3.bf16.msra.mxu1 %v663_v16 }
 0x18c   : > { %2230 = vmatprep.subr.bf16.mxu0 %v2508_v13  ;;  %2238 = vmatprep.subr.bf16.mxu1 %v2508_v13 }
 0x18e   : > { %2219 = vmatmul.mubr.msk.bf16.vlgmr.msra.gmra.mrb[16].mxu0 %vm566_vm1, %v2747_v37  ;;  %2227 = vmatmul.mubr.msk.bf16.vlgmr.msra.gmra.mrb[16].mxu1 %vm566_vm1, %v2747_v37 }
 0x18f   : > { %2231 = vmatpush3.bf16.msra.mxu0 %v664_v21  ;;  %2239 = vmatpush3.bf16.msra.mxu1 %v666_v22 }
 0x190   : > { %2232 = vmatprep.subr.bf16.mxu0 %v2508_v13  ;;  %2240 = vmatprep.subr.bf16.mxu1 %v2508_v13 }
 0x191   : > { %2234 = vmatprep.mubr.msk.bf16.mxu0 %vm2509_vm2, %v2508_v13  ;;  %2242 = vmatprep.mubr.msk.bf16.mxu1 %vm2509_vm2, %v2508_v13 }
 0x193   : > { %2233 = vmatpush3.bf16.msra.mxu0 %v665_v27  ;;  %2241 = vmatpush3.bf16.msra.mxu1 %v667_v28 }
 0x194   : > { %2246 = vmatprep.subr.bf16.mxu0 %v2508_v13  ;;  %2252 = vmatprep.subr.bf16.mxu1 %v2508_v13 }
 0x196   : > { %2235 = vmatmul.mubr.msk.bf16.vlgmr.msra.gmra.mrb[20].mxu0 %vm566_vm1, %v2747_v37  ;;  %2243 = vmatmul.mubr.msk.bf16.vlgmr.msra.gmra.mrb[20].mxu1 %vm566_vm1, %v2747_v37 }
 0x197   : > { %2248 = vmatprep.mubr.msk.bf16.mxu0 %vm2509_vm2, %v2508_v13  ;;  %2254 = vmatprep.mubr.msk.bf16.mxu1 %vm2509_vm2, %v2508_v13 }
 0x241   : > { %v789_v29 = vpop.f32.mrb[0].mxu0  ;;  %v829_v30 = vpop.f32.mrb[0].mxu1 }
 0x242   : > { %v2156_v31 = vpop.f32.mrb[1].mxu0  ;;  %v2164_v32 = vpop.f32.mrb[1].mxu1  ;;  %v790_v2 = vadd.f32 %v2046_v59, %v789_v29  ;;  %v830_v3 = vadd.f32 %v2047_v60, %v829_v30  ;;  %v1428_v59 = vlaneseq }
 0x243   : > { %v792_v33 = vpop.f32.mrb[2].mxu0  ;;  %v832_v34 = vpop.f32.mrb[2].mxu1 }
 0x244   : > { %v2157_v35 = vpop.f32.mrb[3].mxu0  ;;  %v2165_v36 = vpop.f32.mrb[3].mxu1  ;;  %v1235_v12 = vpack.c.bf16 %v790_v2, %v790_v2  ;;  %v1236_v14 = vpack.c.bf16 %v830_v3, %v830_v3  ;;  %v1429_v60 = vshrl.u32 %v1428_v59, 7 }
 0x249   : > { %v869_v38 = vpop.f32.mrb[4].mxu0  ;;  %v909_v39 = vpop.f32.mrb[4].mxu1 }
 0x24a   : > { %v2172_v40 = vpop.f32.mrb[5].mxu0  ;;  %v2180_v37 = vpop.f32.mrb[5].mxu1  ;;  %v870_v25 = vadd.f32 %v2048_v19, %v869_v38  ;;  %v910_v26 = vadd.f32 %v2049_v20, %v909_v39 }
 0x24b   : > { %v872_v41 = vpop.f32.mrb[6].mxu0  ;;  %v912_v42 = vpop.f32.mrb[6].mxu1 }
 0x24c   : > { %v2173_v43 = vpop.f32.mrb[7].mxu0  ;;  %v2181_v44 = vpop.f32.mrb[7].mxu1  ;;  %v1237_v35 = vpack.c.bf16 %v870_v25, %v870_v25  ;;  %v1238_v36 = vpack.c.bf16 %v910_v26, %v910_v26 }
 0x24d   : > { %v2056_v43 = vld [vmem:[%s2681_s19 + $0xa] ss:$0 sm:$0xff]  ;;  %v2057_v44 = vld [vmem:[%s2681_s19 + $0xb] ss:$0 sm:$0xff]  ;;  %s2512_s19 = smov 24  }
 0x251   : > { %v949_v47 = vpop.f32.mrb[8].mxu0  ;;  %v989_v48 = vpop.f32.mrb[8].mxu1 }
 0x252   : > { %v950_v49 = vadd.f32 %v2050_v45, %v949_v47  ;;  %v990_v50 = vadd.f32 %v2051_v46, %v989_v48  ;;  %v2188_v51 = vpop.f32.mrb[9].mxu0  ;;  %v2196_v52 = vpop.f32.mrb[9].mxu1 }
 0x253   : > { %v952_v53 = vpop.f32.mrb[10].mxu0  ;;  %v992_v54 = vpop.f32.mrb[10].mxu1 }
 0x254   : > { %v1239_v55 = vpack.c.bf16 %v950_v49, %v950_v49  ;;  %v1240_v56 = vpack.c.bf16 %v990_v50, %v990_v50  ;;  %v2189_v57 = vpop.f32.mrb[11].mxu0  ;;  %v2197_v58 = vpop.f32.mrb[11].mxu1 }
 0x256   : > { %v1248_v61 = vsel %vm1243_vm3, %v1239_v55, 0  ;;  %v1294_v62 = vsel %vm1243_vm3, %v1240_v56, 0 }
 0x257   : > { %2247 = vmatpush3.bf16.xpose.msra.mxu0 %v1248_v61  ;;  %2253 = vmatpush3.bf16.xpose.msra.mxu1 %v1294_v62  ;;  %v1431_v61 = vand.u32 127, %v1428_v59 }
 0x258   : > { %2258 = vmatprep.subr.bf16.mxu0 %v2508_v13  ;;  %2264 = vmatprep.subr.bf16.mxu1 %v2508_v13 }
 0x259   : > { %v1029_v4 = vpop.f32.mrb[12].mxu0  ;;  %v1069_v5 = vpop.f32.mrb[12].mxu1  ;;  %vm1432_vm5 = vcmp.le.s32.totalorder %v1431_v61, %v1429_v60 }
 0x25a   : > { %v1030_v6 = vadd.f32 %v2052_v63, %v1029_v4  ;;  %v1070_v7 = vadd.f32 %v2053_v0, %v1069_v5  ;;  %v2204_v8 = vpop.f32.mrb[13].mxu0  ;;  %v2212_v9 = vpop.f32.mrb[13].mxu1 }
 0x25b   : > { %v1032_v10 = vpop.f32.mrb[14].mxu0  ;;  %v1072_v11 = vpop.f32.mrb[14].mxu1 }
 0x25c   : > { %v1241_v15 = vpack.c.bf16 %v1030_v6, %v1030_v6  ;;  %v1242_v16 = vpack.c.bf16 %v1070_v7, %v1070_v7  ;;  %v2205_v17 = vpop.f32.mrb[15].mxu0  ;;  %v2213_v18 = vpop.f32.mrb[15].mxu1 }
 0x25e   : > { %v1340_v21 = vsel %vm1243_vm3, %v1241_v15, 0  ;;  %v1386_v22 = vsel %vm1243_vm3, %v1242_v16, 0  ;;  %2249 = vmatmul.mubr.msk.bf16.vlgmr.msra.gmra.mrb[24].mxu0 %vm1243_vm3, %v1235_v12  ;;  %2255 = vmatmul.mubr.msk.bf16.vlgmr.msra.gmra.mrb[24].mxu1 %vm1243_vm3, %v1236_v14 }
 0x25f   : > { %2259 = vmatpush3.bf16.xpose.msra.mxu0 %v1340_v21  ;;  %2265 = vmatpush3.bf16.xpose.msra.mxu1 %v1386_v22 }
 0x260   : > { %2260 = vmatprep.mubr.msk.bf16.mxu0 %vm2509_vm2, %v2508_v13  ;;  %2266 = vmatprep.mubr.msk.bf16.mxu1 %vm2509_vm2, %v2508_v13 }
 0x261   : > { %v1109_v27 = vpop.f32.mrb[16].mxu0  ;;  %v1149_v28 = vpop.f32.mrb[16].mxu1  ;;  %2270 = vmatprep.subr.bf16.mxu0 %v2508_v13  ;;  %2276 = vmatprep.subr.bf16.mxu1 %v2508_v13 }
 0x262   : > { %v1110_v29 = vadd.f32 %v2054_v23, %v1109_v27  ;;  %v1150_v30 = vadd.f32 %v2055_v24, %v1149_v28  ;;  %v2220_v31 = vpop.f32.mrb[17].mxu0  ;;  %v2228_v32 = vpop.f32.mrb[17].mxu1 }
 0x263   : > { %v1112_v33 = vpop.f32.mrb[18].mxu0  ;;  %v1152_v34 = vpop.f32.mrb[18].mxu1 }
 0x264   : > { %v1485_v38 = vpack.c.bf16 %v1110_v29, %v1110_v29  ;;  %v1486_v39 = vpack.c.bf16 %v1150_v30, %v1150_v30  ;;  %v2221_v40 = vpop.f32.mrb[19].mxu0  ;;  %v2229_v37 = vpop.f32.mrb[19].mxu1 }
 0x266   : > { %v1494_v41 = vsel %vm1492_vm4, %v1485_v38, 0  ;;  %v1540_v42 = vsel %vm1492_vm4, %v1486_v39, 0  ;;  %2261 = vmatmul.mubr.msk.bf16.vlgmr.msra.gmra.mrb[28].mxu0 %vm1243_vm3, %v1237_v35  ;;  %2267 = vmatmul.mubr.msk.bf16.vlgmr.msra.gmra.mrb[28].mxu1 %vm1243_vm3, %v1238_v36 }
 0x267   : > { %2271 = vmatpush3.bf16.msra.mxu0 %v1494_v41  ;;  %2277 = vmatpush3.bf16.msra.mxu1 %v1540_v42 }
 0x268   : > { %2272 = vmatprep.mubr.msk.bf16.mxu0 %vm2509_vm2, %v2508_v13  ;;  %2282 = vmatprep.subr.bf16.mxu0 %v2508_v13 }
 0x269   : > { %v1189_v45 = vpop.f32.mrb[20].mxu0  ;;  %v1229_v46 = vpop.f32.mrb[20].mxu1  ;;  %2278 = vmatprep.mubr.msk.bf16.mxu1 %vm2509_vm2, %v2508_v13  ;;  %2288 = vmatprep.subr.bf16.mxu1 %v2508_v13 }
 0x26a   : > { %v1190_v47 = vadd.f32 %v2056_v43, %v1189_v45  ;;  %v1230_v48 = vadd.f32 %v2057_v44, %v1229_v46  ;;  %v2236_v49 = vpop.f32.mrb[21].mxu0  ;;  %v2244_v50 = vpop.f32.mrb[21].mxu1 }
 0x26b   : > { %v1192_v51 = vpop.f32.mrb[22].mxu0  ;;  %v1232_v52 = vpop.f32.mrb[22].mxu1 }
 0x26c   : > { %v1487_v53 = vpack.c.bf16 %v1190_v47, %v1190_v47  ;;  %v1488_v54 = vpack.c.bf16 %v1230_v48, %v1230_v48  ;;  %v2237_v55 = vpop.f32.mrb[23].mxu0  ;;  %v2245_v56 = vpop.f32.mrb[23].mxu1 }
 0x26e   : > { %v2889_v57 = vsel %vm1492_vm4, %v1487_v53, 0  ;;  %v2892_v58 = vsel %vm1492_vm4, %v1488_v54, 0 }
 0x331   : > { %v1284_v62 = vpop.f32.mrb[24].mxu0  ;;  %v1330_v63 = vpop.f32.mrb[24].mxu1 }
 0x332   : > { %v1433_v0 = vsel %vm1432_vm5, %v1284_v62, -1e+30  ;;  %v2250_v2 = vpop.f32.mrb[25].mxu0  ;;  %v2256_v3 = vpop.f32.mrb[25].mxu1  ;;  %v1434_v7 = vsel %vm1432_vm5, %v1330_v63, -1e+30 }
 0x333   : > { %v1287_v4 = vpop.f32.mrb[26].mxu0  ;;  %v1333_v5 = vpop.f32.mrb[26].mxu1  ;;  %v1437_v6 = vsel %vm1243_vm3, %v1433_v0, -inf  ;;  %v1440_v10 = vsel %vm1243_vm3, %v1434_v7, -inf }
 0x334   : > { %v2257_v8 = vpop.f32.mrb[27].mxu1  ;;  %1438 = vmax.xlane.f32.xlu1 %v1437_v6  ;;  %v2251_v9 = vpop.f32.mrb[27].mxu0 }
 0x338   : > { %1441 = vmax.xlane.f32.xlu1 %v1440_v10 }
 0x339   : > { %v1376_v11 = vpop.f32.mrb[28].mxu0  ;;  %v1422_v12 = vpop.f32.mrb[28].mxu1 }
 0x33a   : > { %v1435_v14 = vsel %vm1432_vm5, %v1376_v11, -1e+30  ;;  %v1436_v15 = vsel %vm1432_vm5, %v1422_v12, -1e+30  ;;  %v2262_v16 = vpop.f32.mrb[29].mxu0  ;;  %v2268_v17 = vpop.f32.mrb[29].mxu1 }
 0x33b   : > { %v1379_v18 = vpop.f32.mrb[30].mxu0  ;;  %v1425_v19 = vpop.f32.mrb[30].mxu1  ;;  %v1446_v20 = vsel %vm1243_vm3, %v1436_v15, -inf  ;;  %v1443_v21 = vsel %vm1243_vm3, %v1435_v14, -inf }
 0x33c   : > { %v2269_v22 = vpop.f32.mrb[31].mxu1  ;;  %1447 = vmax.xlane.f32.xlu1 %v1446_v20  ;;  %1444 = vmax.xlane.f32.xlu0 %v1443_v21  ;;  %v2263_v23 = vpop.f32.mrb[31].mxu0 }
 0x3c1   : > { %v1439_v24 = vpop.xlane.xlu1 %1438 }
 0x3c2   : > { %v1449_v25 = vsub.f32 %v1433_v0, %v1439_v24 }
 0x3c4   : > { %v1453_v26 = vmul.f32 1.442695, %v1449_v25 }
 0x3c5   : > { %v1442_v27 = vpop.xlane.xlu1 %1441 }
 0x3c6   : > { %2394 = vpow2.f32 %v1453_v26  ;;  %v1450_v28 = vsub.f32 %v1434_v7, %v1442_v27  ;;  %v1722_v27 = vld [vmem:[%s2687_s11] sm:$0xff] }
 0x3c8   : > { %v1455_v29 = vmul.f32 1.442695, %v1450_v28  ;;  %v1723_v28 = vld [vmem:[%s2687_s11 + $0x8] sm:$0xff] }
 0x3c9   : > { %v1448_v30 = vpop.xlane.xlu1 %1447  ;;  %v1445_v31 = vpop.xlane.xlu0 %1444 }
 0x3ca   : > { %2396 = vpow2.f32 %v1455_v29  ;;  %v1452_v32 = vsub.f32 %v1436_v15, %v1448_v30  ;;  %v1451_v33 = vsub.f32 %v1435_v14, %v1445_v31  ;;  %v1726_v29 = vpack.c.bf16 %v1723_v28, %v1722_v27  ;;  %v1724_v30 = vld [vmem:[%s2687_s11 + $0x10] sm:$0xff]  ;;  %v1725_v31 = vld [vmem:[%s2687_s11 + $0x18] sm:$0xff] }
 0x3cc   : > { %v1459_v34 = vmul.f32 1.442695, %v1452_v32  ;;  %v1457_v35 = vmul.f32 1.442695, %v1451_v33  ;;  %v1727_v32 = vpack.c.bf16 %v1725_v31, %v1724_v30  ;;  %v1780_v33 = vld [vmem:[%s2701_s24] sm:$0xff] }
 0x3ce   : > { %2398 = vpow2.f32 %v1459_v34  ;;  %v1781_v34 = vld [vmem:[%s2701_s24 + $0x8] sm:$0xff] }
 0x3cf   : > { %2400 = vpow2.f32 %v1457_v35  ;;  %v1782_v35 = vld [vmem:[%s2701_s24 + $0x10] sm:$0xff] }
 0x3d0   : > { %v2395_v36 = vpop.eup %2394 }
 0x3d1   : > { %v1461_v38 = vsel %vm1243_vm3, %v2395_v36, 0.0 }
 0x3d2   : > { %1462 = vadd.xlane.f32.xlu0 %v1461_v38  ;;  %v1783_v38 = vld [vmem:[%s2701_s24 + $0x18] sm:$0xff] }
 0x3d4   : > { %v2397_v39 = vpop.eup %2396 }
 0x3d5   : > { %v1464_v40 = vsel %vm1243_vm3, %v2397_v39, 0.0 }
 0x3d6   : > { %1465 = vadd.xlane.f32.xlu1 %v1464_v40 }
 0x3d8   : > { %v2399_v37 = vpop.eup %2398 }
 0x3d9   : > { %v2401_v41 = vpop.eup %2400  ;;  %v1470_v42 = vsel %vm1243_vm3, %v2399_v37, 0.0 }
 0x3da   : > { %1471 = vadd.xlane.f32.xlu1 %v1470_v42  ;;  %v1467_v43 = vsel %vm1243_vm3, %v2401_v41, 0.0 }
 0x3db   : > { %1468 = vadd.xlane.f32.xlu0 %v1467_v43  ;;  %v2078_v43 = vld [vmem:[%s3074_s29] ss:$0 sm:$0xff] }
 0x45f   : > { %v1463_v44 = vpop.xlane.xlu0 %1462 }
 0x460   : > { %2402 = vrcp.f32 %v1463_v44 }
 0x463   : > { %v1466_v45 = vpop.xlane.xlu1 %1465 }
 0x464   : > { %2404 = vrcp.f32 %v1466_v45  ;;  %v2079_v45 = vld [vmem:[%s3075_s12] ss:$0 sm:$0xff]  ;;  %s2418_s12 = scalar_lea.vmem %s2417_s25, 256 }
 0x467   : > { %v1472_v46 = vpop.xlane.xlu1 %1471 }
 0x468   : > { %2406 = vrcp.f32 %v1472_v46  ;;  %v1469_v47 = vpop.xlane.xlu0 %1468 }
 0x469   : > { %2408 = vrcp.f32 %v1469_v47 }
 0x46a   : > { %v2403_v48 = vpop.eup %2402 }
 0x46b   : > { %v1477_v49 = vmul.f32 %v2403_v48, %v2395_v36  ;;  %v1788_v36 = vpack.c.bf16 %v1781_v34, %v1780_v33 }
 0x46d   : > { %v1481_v50 = vpack.c.bf16 %v1477_v49, %v1477_v49  ;;  %v1784_v49 = vld [vmem:[%s2701_s24 + $0x20] sm:$0xff] }
 0x46e   : > { %v2405_v51 = vpop.eup %2404 }
 0x46f   : > { %v1478_v52 = vmul.f32 %v2405_v51, %v2397_v39  ;;  %2273 = vmatmul.mubr.msk.bf16.vlgmr.msra.gmra.mrb[32].mxu0 %vm1243_vm3, %v1481_v50  ;;  %v1789_v39 = vpack.c.bf16 %v1783_v38, %v1782_v35  ;;  %v1785_v50 = vld [vmem:[%s2701_s24 + $0x28] sm:$0xff] }
 0x470   : > { %2283 = vmatpush3.bf16.msra.mxu0 %v2889_v57  ;;  %2284 = vmatprep.mubr.msk.bf16.mxu0 %vm2509_vm2, %v2508_v13  ;;  %v1790_v51 = vpack.c.bf16 %v1785_v50, %v1784_v49 }
 0x471   : > { %v1482_v53 = vpack.c.bf16 %v1478_v52, %v1478_v52  ;;  %2294 = vmatprep.subr.bf16.mxu0 %v2508_v13  ;;  %v1786_v52 = vld [vmem:[%s2701_s24 + $0x30] sm:$0xff] }
 0x472   : > { %v2407_v54 = vpop.eup %2406 }
 0x473   : > { %v2409_v55 = vpop.eup %2408  ;;  %2279 = vmatmul.mubr.msk.bf16.vlgmr.msra.gmra.mrb[32].mxu1 %vm1243_vm3, %v1482_v53  ;;  %v1480_v59 = vmul.f32 %v2407_v54, %v2399_v37  ;;  %v1787_v53 = vld [vmem:[%s2701_s24 + $0x38] sm:$0xff] }
 0x474   : > { %v1479_v56 = vmul.f32 %v2409_v55, %v2401_v41  ;;  %2289 = vmatpush3.bf16.msra.mxu1 %v2892_v58  ;;  %2290 = vmatprep.mubr.msk.bf16.mxu1 %vm2509_vm2, %v2508_v13  ;;  %v1791_v54 = vpack.c.bf16 %v1787_v53, %v1786_v52  ;;  %v2080_v55 = vld [vmem:[%s546_s17] ss:$0 sm:$0xff]  ;;  %s1859_s17 = sshll.u32 %s2703_s15, 4  ;;  %s2971_s17 = int_to_ptr.vmem [resolvable:$true] %s1859_s17 }
 0x475   : > { %2302 = vmatprep.subr.bf16.mxu1 %v2508_v13  ;;  %v1484_v60 = vpack.c.bf16 %v1480_v59, %v1480_v59  ;;  %s2412_s29 = scalar_lea.vmem %s2971_s17, 128  ;;  %p2419_p5 = scmp.lt.s32.totalorder %s2971_s17, %s2417_s25 }
 0x476   : > { %v1483_v57 = vpack.c.bf16 %v1479_v56, %v1479_v56  ;;  %p2413_p1 = scmp.ne.s32.totalorder %s2971_s17, %s2412_s29  ;;  %p2420_p6 = scmp.lt.s32.totalorder %s2418_s12, %s2412_s29 }
 0x478   : > { %2285 = vmatmul.mubr.msk.bf16.vlgmr.msra.gmra.mrb[36].mxu0 %vm1243_vm3, %v1483_v57  ;;  %p2414_p2 = pnand %p2413_p1, %p2623_p3  ;;  %p2421_p7 = por %p2420_p6, %p2419_p5 }
 0x479   : > { %2298 = vmatprep.mubr.msk.bf16.mxu0 %vm2509_vm2, %v2508_v13  ;;  %2295 = vmatpush3.bf16.msra.mxu0 %v1726_v29 }
 0x47a   : > { %2296 = vmatprep.subr.bf16.mxu0 %v2508_v13  ;;  %p2415_p4 = pneg %p2414_p2 }
 0x47b   : > { %2291 = vmatmul.mubr.msk.bf16.vlgmr.msra.gmra.mrb[36].mxu1 %vm1243_vm3, %v1484_v60 }
 0x47c   : > { %2310 = vmatprep.mubr.msk.bf16.mxu1 %vm2509_vm2, %v2508_v13  ;;  %2303 = vmatpush3.bf16.msra.mxu1 %v1788_v36  ;;  %p2422_p8 = pnand %p2421_p7, %p2415_p4 }
 0x47d   : > { %2297 = vmatpush3.bf16.msra.mxu0 %v1727_v32  ;;  %2304 = vmatprep.subr.bf16.mxu1 %v2508_v13 }
 0x480   : > { %2305 = vmatpush3.bf16.msra.mxu1 %v1789_v39 }
 0x481   : > { %2306 = vmatprep.subr.bf16.mxu1 %v2508_v13 }
 0x484   : > { %2307 = vmatpush3.bf16.msra.mxu1 %v1790_v51 }
 0x485   : > { %2308 = vmatprep.subr.bf16.mxu1 %v2508_v13 }
 0x488   : > { %2309 = vmatpush3.bf16.msra.mxu1 %v1791_v54 }
 0x542   : > { %v1530_v61 = vpop.f32.mrb[32].mxu0 }
 0x543   : > { %v2274_v58 = vpop.f32.mrb[33].mxu0 }
 0x544   : > { %v1533_v62 = vpop.f32.mrb[34].mxu0 }
 0x545   : > { %v2275_v63 = vpop.f32.mrb[35].mxu0  ;;  %v2082_v62 = vld [vmem:[%s554_s28] ss:$0 sm:$0xff]  ;;  %s1846_s28 = scalar_lea.sflag [#allocation3], %s3081_s26 }
 0x546   : > { %v1576_v0 = vpop.f32.mrb[32].mxu1 }
 0x547   : > { %v2280_v2 = vpop.f32.mrb[33].mxu1  ;;  %1675 = vrot.lane.b32.xlu0 %v1576_v0, %s2510_s20 }
 0x548   : > { %v1579_v3 = vpop.f32.mrb[34].mxu1 }
 0x549   : > { %v2281_v4 = vpop.f32.mrb[35].mxu1 }
 0x54b   : > { %v1622_v5 = vpop.f32.mrb[36].mxu0 }
 0x54c   : > { %1679 = vrot.lane.b32.xlu1 %v1622_v5, %s2511_s23  ;;  %v2286_v6 = vpop.f32.mrb[37].mxu0 }
 0x54d   : > { %v1625_v7 = vpop.f32.mrb[38].mxu0 }
 0x54e   : > { %v2287_v8 = vpop.f32.mrb[39].mxu0  ;;  %v1668_v9 = vpop.f32.mrb[36].mxu1 }
 0x54f   : > { %v2292_v10 = vpop.f32.mrb[37].mxu1 }
 0x550   : > { %1683 = vrot.lane.b32.xlu1 %v1668_v9, %s2512_s19  ;;  %v1671_v11 = vpop.f32.mrb[38].mxu1  ;;  %s3079_s19 = sld [smem:[#allocation19_spill]] }
 0x551   : > { %v2293_v12 = vpop.f32.mrb[39].mxu1 }
 0x556   : > { %s3080_s14 = smov %s3079_s19  ;;  %s2969_s11 = scalar_lea.hbm %s3079_s19, %s2085_s16 }
 0x5b9   : > { %v1676_v14 = vpop.permute.xlu0 %1675 }
 0x5ba   : > { %v1686_v16 = vsel %vm1243_vm3, %v1530_v61, %v1676_v14 }
 0x5be   : > { %v1680_v15 = vpop.permute.xlu1 %1679 }
 0x5bf   : > { %v1688_v17 = vsel %vm1687_vm6, %v1686_v16, %v1680_v15 }
 0x5c2   : > { %v1684_v18 = vpop.permute.xlu1 %1683 }
 0x5c3   : > { %v1690_v19 = vsel %vm1689_vm7, %v1688_v17, %v1684_v18 }
 0x5c4   : > { %v1691_v20 = vadd.f32 %v1690_v19, %v2708_v1 }
 0x5c6   : > { %v1694_v21 = vsel %vm566_vm1, %v1691_v20, 0.0 }
 0x5c7   : > { %1695 = vadd.xlane.f32.xlu1 %v1694_v21 }
 0x654   : > { %v1696_v22 = vpop.xlane.xlu1 %1695 }
 0x655   : > { %v1697_v23 = vmul.f32 0.03125, %v1696_v22 }
 0x657   : > { %v1698_v24 = vsub.f32 %v1691_v20, %v1697_v23 }
 0x659   : > { %v1699_v25 = vmul.f32 %v1698_v24, %v1698_v24 }
 0x65b   : > { %v1700_v26 = vsel %vm566_vm1, %v1699_v25, 0.0 }
 0x65c   : > { %1701 = vadd.xlane.f32.xlu0 %v1700_v26 }
 0x6e9   : > { %v1702_v40 = vpop.xlane.xlu0 %1701 }
 0x6ea   : > { %v1703_v37 = vmul.f32 0.03125, %v1702_v40 }
 0x6ec   : > { %v1704_v41 = vadd.f32 1e-05, %v1703_v37 }
 0x6ee   : > { %2410 = vrsqrt.f32 %v1704_v41 }
 0x6f8   : > { %v2411_v42 = vpop.eup %2410 }
 0x6f9   : > { %v1706_v44 = vmul.f32 %v2411_v42, %v1698_v24 }
 0x6fb   : > { %v1713_v46 = vmul.f32 %v2078_v43, %v1706_v44 }
 0x6fd   : > { %v1720_v47 = vadd.f32 %v2079_v45, %v1713_v46 }
 0x6ff   : > { %v1721_v48 = vpack.c.bf16 %v1720_v47, %v1720_v47 }
 0x701   : > { %2299 = vmatmul.mubr.msk.bf16.vlgmr.msra.gmra.mrb[40].mxu0 %vm566_vm1, %v1721_v48 }
 0x7d4   : > { %v1772_v56 = vpop.f32.mrb[40].mxu0 }
 0x7d5   : > { %v1773_v59 = vadd.f32 %v2080_v55, %v1772_v56  ;;  %v2300_v57 = vpop.f32.mrb[41].mxu0 }
 0x7d6   : > { %v1775_v60 = vpop.f32.mrb[42].mxu0 }
 0x7d7   : > { %v1778_v61 = vmax.f32 %v1773_v59, 0.0  ;;  %v2301_v58 = vpop.f32.mrb[43].mxu0 }
 0x7d9   : > { %v1779_v13 = vpack.c.bf16 %v1778_v61, %v1778_v61 }
 0x7db   : > { %2311 = vmatmul.mubr.msk.bf16.vlgmr.msra.gmra.mrb[40].mxu1 %vm1799_vm8, %v1779_v13 }
 0x8ae   : > { %v1837_v63 = vpop.f32.mrb[40].mxu1 }
 0x8af   : > { %v1838_v0 = vadd.f32 %v2082_v62, %v1837_v63  ;;  %v2312_v2 = vpop.f32.mrb[41].mxu1 }
 0x8b0   : > { %v1840_v3 = vpop.f32.mrb[42].mxu1 }
 0x8b1   : > { %v1843_v4 = vadd.f32 %v1838_v0, %v2708_v1  ;;  %v2313_v5 = vpop.f32.mrb[43].mxu1 }
 0x8b3   : > { %1844 = vst.msk [vmem:[%s2703_s15] sm:$0xff] %vm566_vm1, %v1843_v4 }
 0x8b4   : > { %2425 = shalt.err (!%p2422_p8)
}
 0x8b5   : > { %s2426_s15 = scalar_lea.hbm %s2969_s11, 128  ;;  %s2430_s18 = scalar_lea.hbm %s3080_s14, 256 }
 0x8b6   : > { %p2427_p10 = scmp.ne.s32.totalorder %s2969_s11, %s2426_s15  ;;  %p2431_p13 = scmp.lt.u32.totalorder %s2969_s11, %s3080_s14 }
 0x8b7   : > { %p2432_p0 = scmp.lt.u32.totalorder %s2430_s18, %s2426_s15  ;;  %p2434_p2 = scmp.lt.u32.totalorder %s2426_s15, %s2969_s11 }
 0x8b8   : > { %p2428_p11 = pnand %p2427_p10, %p2623_p3 }
 0x8b9   : > { %p2433_p1 = por %p2432_p0, %p2431_p13 }
 0x8ba   : > { %p2429_p12 = pneg %p2428_p11 }
 0x8bb   : > { %p2435_p4 = por %p2434_p2, %p2433_p1 }
 0x8bd   : > { %p2436_p5 = pnand %p2435_p4, %p2429_p12 }
 0x8bf   : > { %2439 = shalt.err (!%p2436_p5)
}
 0x8c0   : > { %2316 = dma.vmem_to_hbm [thread:$0]  (%p2623_p3), %s2971_s17, 128, %s2969_s11, %s1846_s28  }
 0x8c1 PF: > { %s3082_s27 = sld [smem:[#allocation12_spill]]  ;;  %s3083_s16 = sld [smem:[#allocation5_spill]] }
 0x8c7   : > { %p2322_p6 = scmp.ge.s32.totalorder %s3082_s27, 2  ;;  %s1871_s23 = sand.u32 1, %s3083_s16  }
 0x8c8   : > { %s1872_s19 = scalar_lea.sflag [#allocation3], %s1871_s23 }
 0x8c9   : > { %p2319_p7 = pnand %p2322_p6, %p2633_p9 }
 0x8cb   : > { %2473 = dma.done.wait (!%p2319_p7), %s1872_s19, 128  }
 0x8cc   : > { %2475 = vsyncadd (!%p2319_p7), %s1872_s19, 4294967168  ;;  %s24_s24 = sadd.s32 1, %s3082_s27   ;;  %s3085_s17 = sld [smem:[#allocation6_spill]] }
 0x8cd   : > { %p21_p8 = scmp.ge.s32.totalorder %s24_s24, 6   ;;  %s3086_s18 = sld [smem:[#allocation7_spill]] }
 0x8ce   : > { %s3087_s19 = sld [smem:[#allocation17_spill]]  ;;  %s3088_s20 = sld [smem:[#allocation10_spill]] }
 0x8cf   : > { %s3089_s21 = sld [smem:[#allocation11_spill]]  ;;  %s3090_s22 = sld [smem:[#allocation13_spill]] }
 0x8d0   : > { %s3091_s23 = sld [smem:[#allocation15_spill]]  ;;  %23 = sbr.rel (!%p21_p8) target bundleno = 8 (0x8), region = 133 }
 0x8d7   :  { %1877 = vsyncpa [#allocation3], 1 }
 0x8d8   :  { %1879 = vsyncpa [#allocation3 + $0x1], 1 }

</bundles_post_ra>
